<compile_context>
chip_gen: v5e
topology: v5e:2x2
jax: 0.10.0
libtpu: 0.0.40
codegen_flags: <defaults>
</compile_context>

<pallas_src>
import math
import functools

import jax
import jax.numpy as jnp
from jax.experimental import pallas as pl
from jax.experimental.pallas import tpu as pltpu


def _mhsa_kernel(x_ref, mrow_ref, mcol_ref,
                 w_inp_ref, w_out_ref, gamma_ref, beta_ref,
                 w1_ref, b1_ref, w2_ref, b2_ref,
                 o_ref, *, num_heads):
    Bb, T, D2 = x_ref.shape
    BT = Bb * T
    dh = D2 // num_heads
    mxu_dtype = w_inp_ref.dtype                    # bf16 (fast) or f32 (exact)
    low_precision = mxu_dtype != jnp.float32

    # Flatten (Bb, T, D2) -> (Bb*T, D2): last (lane) dim untouched -> cheap.
    x2 = x_ref[...].reshape(BT, D2)

    m_row = mrow_ref[...]                                   # (Bb, 1, T)  1.0 = pad key
    keep_flat = (1.0 - mcol_ref[...]).reshape(BT, 1)        # (Bb*T, 1)   1.0 = valid row

    # --- input projection -> Q, K, V (one matmul with M = Bb*T rows) -------
    qkv = jnp.dot(x2.astype(mxu_dtype), w_inp_ref[...],
                  preferred_element_type=jnp.float32)       # (BT, 3*D2) f32
    q2 = qkv[:, 0 * D2:1 * D2]
    k2 = qkv[:, 1 * D2:2 * D2]
    # Only V needs pad-zeroing: pad keys are excluded by the score mask and
    # pad query rows are zeroed after the output projection.
    v2 = qkv[:, 2 * D2:3 * D2] * keep_flat

    # Score mask: key is padded OR diagonal.  (Query-pad rows need no masking
    # here; they are zeroed by keep_flat after the output projection.)
    row_i = jax.lax.broadcasted_iota(jnp.int32, (T, T), 0)
    col_i = jax.lax.broadcasted_iota(jnp.int32, (T, T), 1)
    sim_mask = (row_i == col_i)[None] | (m_row > 0.5)       # (Bb, T, T) bool

    scale = 1.0 / math.sqrt(D2 / num_heads)                 # 1/sqrt(inp_dim/num_heads)

    # --- per-head attention, accumulating the output projection ------------
    # attn @ W_out == sum_h head_h @ W_out[h*dh:(h+1)*dh, :]   (no concat, no .T)
    qk_dims = (((2,), (2,)), ((0,), (0,)))   # contract dh, batch over Bb
    pv_dims = (((2,), (1,)), ((0,), (0,)))   # contract T,  batch over Bb
    acc = jnp.zeros((BT, D2), jnp.float32)
    for h in range(num_heads):
        sl = slice(h * dh, (h + 1) * dh)
        qh = q2[:, sl].reshape(Bb, T, dh).astype(mxu_dtype)
        kh = k2[:, sl].reshape(Bb, T, dh).astype(mxu_dtype)
        vh = v2[:, sl].reshape(Bb, T, dh).astype(mxu_dtype)

        s = jax.lax.dot_general(qh, kh, qk_dims,
                                preferred_element_type=jnp.float32)      # (Bb,T,T)
        s = jnp.where(sim_mask, -1e10, s * scale)
        s = s - jnp.max(s, axis=-1, keepdims=True)
        p = jnp.exp(s)
        denom = jnp.sum(p, axis=-1, keepdims=True)
        if low_precision:
            p = p * pl.reciprocal(denom, approx=True)        # EUP vrcp
        else:
            p = p / denom                                    # exact path
        head = jax.lax.dot_general(p.astype(mxu_dtype), vh, pv_dims,
                                   preferred_element_type=jnp.float32)   # (Bb,T,dh)
        acc = acc + jnp.dot(head.reshape(BT, dh).astype(mxu_dtype),
                            w_out_ref[sl, :],
                            preferred_element_type=jnp.float32)

    # Zero pad query rows (pre-/post-projection masking collapse to one multiply
    # since keep is {0,1} and acts per row).
    attn = acc * keep_flat                                   # (BT, D2) f32

    # --- feed-forward: LayerNorm -> Linear -> ReLU -> Linear, + residual ---
    residual = attn
    mu = jnp.mean(attn, axis=-1, keepdims=True)
    var = jnp.mean((attn - mu) ** 2, axis=-1, keepdims=True)
    ln = (attn - mu) * jax.lax.rsqrt(var + 1e-5)
    ln = ln * gamma_ref[...] + beta_ref[...]
    h1 = jnp.maximum(
        jnp.dot(ln.astype(mxu_dtype), w1_ref[...],
                preferred_element_type=jnp.float32) + b1_ref[...], 0.0)
    out = residual + jnp.dot(h1.astype(mxu_dtype), w2_ref[...],
                             preferred_element_type=jnp.float32) + b2_ref[...]

    o_ref[...] = out.reshape(Bb, T, D2).astype(o_ref.dtype)


def _choose_batch_block(B, T, max_rows=512):
    """Largest divisor Bb of B with Bb*T <= max_rows (at least 1)."""
    best = 1
    for d in range(1, B + 1):
        if B % d == 0 and d * T <= max_rows:
            best = d
    return best


def multi_head_self_attn(x, mask, params, num_heads, mxu_dtype=jnp.bfloat16):
    """x: (B, T, 2D) f32; mask: (B, T) f32 (1.0 = pad)."""
    B, T, D2 = x.shape
    w_inp, w_out, gamma, beta, w1, b1, w2, b2 = params
    D6 = w_inp.shape[1]
    D8 = w1.shape[1]

    # Batch Bb sequences per grid step (big MXU win at small T); axis stays
    # "parallel" so the megacore scheduler can shard it on multi-TC chips.
    Bb = _choose_batch_block(B, T)

    m = mask.astype(jnp.float32)
    m_row = m.reshape(B, 1, T)
    m_col = m.reshape(B, T, 1)   # tiny (B*T*4 B); kept as an input to avoid an in-kernel relayout

    wc = lambda w: w.astype(mxu_dtype)   # bf16 weights halve weight DMA/VMEM in fast path
    wbytes = 2 if mxu_dtype != jnp.float32 else 4

    def const2d(shape):
        return pl.BlockSpec(shape, lambda b: (0, 0))

    flops = 2 * B * T * (D2 * D6 + D2 * D2 + D2 * D8 + D8 * D2) + 4 * B * T * T * D2
    transcendentals = B * num_heads * T * T + 2 * B * T
    bytes_accessed = (2 * B * T * D2 * 4 + 2 * B * T * 4
                      + (D2 * D6 + D2 * D2 + D2 * D8 + D8 * D2) * wbytes
                      + (3 * D2 + D8) * 4)

    return pl.pallas_call(
        functools.partial(_mhsa_kernel, num_heads=num_heads),
        out_shape=jax.ShapeDtypeStruct((B, T, D2), x.dtype),
        grid=(B // Bb,),
        in_specs=[
            pl.BlockSpec((Bb, T, D2), lambda b: (b, 0, 0)),   # x
            pl.BlockSpec((Bb, 1, T), lambda b: (b, 0, 0)),    # mask, row layout
            pl.BlockSpec((Bb, T, 1), lambda b: (b, 0, 0)),    # mask, col layout
            const2d((D2, D6)),                                # inp_linear W
            const2d((D2, D2)),                                # output_linear W
            const2d((1, D2)),                                 # LN gamma
            const2d((1, D2)),                                 # LN beta
            const2d((D2, D8)),                                # conv1 W
            const2d((1, D8)),                                 # conv1 b
            const2d((D8, D2)),                                # conv2 W
            const2d((1, D2)),                                 # conv2 b
        ],
        out_specs=pl.BlockSpec((Bb, T, D2), lambda b: (b, 0, 0)),
        compiler_params=pltpu.CompilerParams(dimension_semantics=("parallel",)),
        cost_estimate=pl.CostEstimate(flops=int(flops),
                                      transcendentals=int(transcendentals),
                                      bytes_accessed=int(bytes_accessed)),
    )(x, m_row, m_col, wc(w_inp), wc(w_out), gamma, beta, wc(w1), b1, wc(w2), b2)


def reference(x, mask, params, num_heads):
    """Pure-JAX f32 replica of the PyTorch forward (eval mode)."""
    w_inp, w_out, gamma, beta, w1, b1, w2, b2 = params
    B, T, D2 = x.shape
    dh = D2 // num_heads
    m = mask.astype(jnp.float32)
    keep = 1.0 - m

    qkv = x @ w_inp
    q, k, v = jnp.split(qkv, 3, axis=-1)

    def per_head(a):
        a = a * keep[:, :, None]
        return a.reshape(B, T, num_heads, dh).transpose(0, 2, 1, 3)

    qh, kh, vh = per_head(q), per_head(k), per_head(v)
    qh = qh / math.sqrt(D2 / num_heads)
    s = jnp.einsum('bhqd,bhkd->bhqk', qh, kh)
    eye = jnp.eye(T, dtype=jnp.float32)
    sim_mask = (m[:, :, None] + m[:, None, :] + eye[None]) >= 1.0
    s = jnp.where(sim_mask[:, None], -1e10, s)
    p = jax.nn.softmax(s, axis=-1)
    attn = jnp.einsum('bhqk,bhkd->bhqd', p, vh)
    attn = attn.transpose(0, 2, 1, 3).reshape(B, T, D2)
    attn = attn * keep[:, :, None]
    attn = attn @ w_out
    attn = attn * keep[:, :, None]

    residual = attn
    mu = attn.mean(-1, keepdims=True)
    var = ((attn - mu) ** 2).mean(-1, keepdims=True)
    ln = (attn - mu) / jnp.sqrt(var + 1e-5) * gamma.reshape(1, 1, -1) + beta.reshape(1, 1, -1)
    h1 = jax.nn.relu(ln @ w1 + b1.reshape(1, 1, -1))
    return residual + h1 @ w2 + b2.reshape(1, 1, -1)


def init_params(key, model_dim):
    D2, D6, D8 = 2 * model_dim, 6 * model_dim, 8 * model_dim
    ks = jax.random.split(key, 4)

    def xavier(k, fan_in, fan_out):
        std = math.sqrt(2.0 / (fan_in + fan_out))
        return std * jax.random.normal(k, (fan_in, fan_out), jnp.float32)

    w_inp = xavier(ks[0], D2, D6)           # inp_linear (bias=False)
    w_out = xavier(ks[1], D2, D2)           # output_linear (bias=False)
    w1 = xavier(ks[2], D2, D8)              # conv1
    b1 = jnp.zeros((1, D8), jnp.float32)    # zeroed in __init__
    w2 = xavier(ks[3], D8, D2)              # conv2
    b2 = jnp.zeros((1, D2), jnp.float32)    # zeroed in __init__
    gamma = jnp.ones((1, D2), jnp.float32)  # LayerNorm defaults
    beta = jnp.zeros((1, D2), jnp.float32)
    return (w_inp, w_out, gamma, beta, w1, b1, w2, b2)


if __name__ == "__main__":
    model_dim = 16
    num_heads = 4
    B, T = 2, 8
    D2 = 2 * model_dim

    key = jax.random.PRNGKey(0)
    k_x, k_p = jax.random.split(key)
    x = jax.random.normal(k_x, (B, T, D2), jnp.float32)

    # context_mask: 1.0 = padded position (masked out), 0.0 = valid.
    mask = jnp.zeros((B, T), jnp.float32).at[1, 6:].set(1.0)

    params = init_params(k_p, model_dim)
    ref = reference(x, mask, params, num_heads)

    # Exact-precision path (f32 MXU operands) -> tight check against reference.
    out_f32 = jax.block_until_ready(
        multi_head_self_attn(x, mask, params, num_heads, mxu_dtype=jnp.float32))
    assert out_f32.shape == (B, T, D2)
    assert jnp.allclose(out_f32, ref, atol=1e-4, rtol=1e-4), "f32 kernel mismatch vs reference"

    # Default fast path: bf16 MXU operands with f32 accumulation -> loose check.
    out = jax.block_until_ready(multi_head_self_attn(x, mask, params, num_heads))
    assert out.shape == (B, T, D2)
    rel_err = float(jnp.linalg.norm(out - ref) / jnp.linalg.norm(ref))
    assert rel_err < 5e-2, f"bf16 kernel relative error too large: {rel_err}"

    print("KERNEL_OK")
</pallas_src>

<mosaic_0001>
module attributes {stable_mosaic.version = 11 : i64} {
  func.func @_mhsa_kernel(%arg0: i32, %arg1: memref<2x8x32xf32, #tpu.memory_space<vmem>>, %arg2: memref<2x1x8xf32, #tpu.memory_space<vmem>>, %arg3: memref<2x8x1xf32, #tpu.memory_space<vmem>>, %arg4: memref<32x96xf32, #tpu.memory_space<vmem>>, %arg5: memref<32x32xf32, #tpu.memory_space<vmem>>, %arg6: memref<1x32xf32, #tpu.memory_space<vmem>>, %arg7: memref<1x32xf32, #tpu.memory_space<vmem>>, %arg8: memref<32x128xf32, #tpu.memory_space<vmem>>, %arg9: memref<1x128xf32, #tpu.memory_space<vmem>>, %arg10: memref<128x32xf32, #tpu.memory_space<vmem>>, %arg11: memref<1x32xf32, #tpu.memory_space<vmem>>, %arg12: memref<2x8x32xf32, #tpu.memory_space<vmem>>) attributes {dimension_semantics = [#tpu.dimension_semantics<parallel>], iteration_bounds = array<i64: 1>, scalar_prefetch = 0 : i64, scratch_operands = 0 : i64, tpu.core_type = #tpu.core_type<tc>, window_params = [{transform_indices = @transform_0, window_bounds = array<i64: 2, 8, 32>}, {transform_indices = @transform_1, window_bounds = array<i64: 2, 1, 8>}, {transform_indices = @transform_2, window_bounds = array<i64: 2, 8, 1>}, {pipeline_mode = #tpu.pipeline_mode<synchronous>, transform_indices = @transform_3, window_bounds = array<i64: 32, 96>}, {pipeline_mode = #tpu.pipeline_mode<synchronous>, transform_indices = @transform_4, window_bounds = array<i64: 32, 32>}, {pipeline_mode = #tpu.pipeline_mode<synchronous>, transform_indices = @transform_5, window_bounds = array<i64: 1, 32>}, {pipeline_mode = #tpu.pipeline_mode<synchronous>, transform_indices = @transform_6, window_bounds = array<i64: 1, 32>}, {pipeline_mode = #tpu.pipeline_mode<synchronous>, transform_indices = @transform_7, window_bounds = array<i64: 32, 128>}, {pipeline_mode = #tpu.pipeline_mode<synchronous>, transform_indices = @transform_8, window_bounds = array<i64: 1, 128>}, {pipeline_mode = #tpu.pipeline_mode<synchronous>, transform_indices = @transform_9, window_bounds = array<i64: 128, 32>}, {pipeline_mode = #tpu.pipeline_mode<synchronous>, transform_indices = @transform_10, window_bounds = array<i64: 1, 32>}, {transform_indices = @transform_11, window_bounds = array<i64: 2, 8, 32>}]} {
    %c0 = arith.constant 0 : index
    %c0_0 = arith.constant 0 : index
    %c0_1 = arith.constant 0 : index
    %0 = vector.load %arg1[%c0, %c0_0, %c0_1] : memref<2x8x32xf32, #tpu.memory_space<vmem>>, vector<2x8x32xf32>
    %1 = vector.shape_cast %0 : vector<2x8x32xf32> to vector<16x32xf32>
    %c0_2 = arith.constant 0 : index
    %c0_3 = arith.constant 0 : index
    %c0_4 = arith.constant 0 : index
    %2 = vector.load %arg2[%c0_2, %c0_3, %c0_4] : memref<2x1x8xf32, #tpu.memory_space<vmem>>, vector<2x1x8xf32>
    %c0_5 = arith.constant 0 : index
    %c0_6 = arith.constant 0 : index
    %c0_7 = arith.constant 0 : index
    %3 = vector.load %arg3[%c0_5, %c0_6, %c0_7] : memref<2x8x1xf32, #tpu.memory_space<vmem>>, vector<2x8x1xf32>
    %cst = arith.constant 1.000000e+00 : f32
    %4 = vector.broadcast %cst : f32 to vector<2x8x1xf32>
    %5 = arith.subf %4, %3 : vector<2x8x1xf32>
    %6 = vector.shape_cast %5 : vector<2x8x1xf32> to vector<16x1xf32>
    %c0_8 = arith.constant 0 : index
    %c0_9 = arith.constant 0 : index
    %7 = vector.load %arg4[%c0_8, %c0_9] : memref<32x96xf32, #tpu.memory_space<vmem>>, vector<32x96xf32>
    %cst_10 = arith.constant dense<0.000000e+00> : vector<16x96xf32>
    %8 = tpu.matmul %1, %7, %cst_10 {dimension_numbers = #tpu.dot_dimension_numbers<[1], [0], [0], [1], [0, 0, 1, 1], [], []>} : vector<16x32xf32>, vector<32x96xf32>, vector<16x96xf32> -> vector<16x96xf32>
    %9 = vector.extract_strided_slice %8 {offsets = [0, 0], sizes = [16, 32], strides = [1, 1]} : vector<16x96xf32> to vector<16x32xf32>
    %10 = vector.extract_strided_slice %8 {offsets = [0, 32], sizes = [16, 32], strides = [1, 1]} : vector<16x96xf32> to vector<16x32xf32>
    %11 = vector.extract_strided_slice %8 {offsets = [0, 64], sizes = [16, 32], strides = [1, 1]} : vector<16x96xf32> to vector<16x32xf32>
    %12 = vector.broadcast %6 : vector<16x1xf32> to vector<16x32xf32>
    %13 = arith.mulf %11, %12 : vector<16x32xf32>
    %14 = tpu.iota {dimensions = array<i32: 0>} : vector<8x8xi32>
    %15 = tpu.iota {dimensions = array<i32: 1>} : vector<8x8xi32>
    %16 = arith.cmpi eq, %14, %15 : vector<8x8xi32>
    %17 = vector.shape_cast %16 : vector<8x8xi1> to vector<1x8x8xi1>
    %cst_11 = arith.constant 5.000000e-01 : f32
    %18 = vector.broadcast %cst_11 : f32 to vector<2x1x8xf32>
    %19 = arith.cmpf ogt, %2, %18 : vector<2x1x8xf32>
    %20 = vector.broadcast %17 : vector<1x8x8xi1> to vector<2x8x8xi1>
    %21 = vector.broadcast %19 : vector<2x1x8xi1> to vector<2x8x8xi1>
    %22 = arith.ori %20, %21 : vector<2x8x8xi1>
    %cst_12 = arith.constant 0.000000e+00 : f32
    %23 = vector.broadcast %cst_12 : f32 to vector<16x32xf32>
    %24 = vector.extract_strided_slice %9 {offsets = [0, 0], sizes = [16, 8], strides = [1, 1]} : vector<16x32xf32> to vector<16x8xf32>
    %25 = vector.shape_cast %24 : vector<16x8xf32> to vector<2x8x8xf32>
    %26 = vector.extract_strided_slice %10 {offsets = [0, 0], sizes = [16, 8], strides = [1, 1]} : vector<16x32xf32> to vector<16x8xf32>
    %27 = vector.shape_cast %26 : vector<16x8xf32> to vector<2x8x8xf32>
    %28 = vector.extract_strided_slice %13 {offsets = [0, 0], sizes = [16, 8], strides = [1, 1]} : vector<16x32xf32> to vector<16x8xf32>
    %29 = vector.shape_cast %28 : vector<16x8xf32> to vector<2x8x8xf32>
    %cst_13 = arith.constant dense<0.000000e+00> : vector<2x8x8xf32>
    %30 = tpu.matmul %25, %27, %cst_13 {dimension_numbers = #tpu.dot_dimension_numbers<[2], [2], [1], [1], [0, 0, 0, 1, 1, 1], [0], [0]>} : vector<2x8x8xf32>, vector<2x8x8xf32>, vector<2x8x8xf32> -> vector<2x8x8xf32>
    %cst_14 = arith.constant 0.353553385 : f32
    %31 = vector.broadcast %cst_14 : f32 to vector<2x8x8xf32>
    %32 = arith.mulf %30, %31 : vector<2x8x8xf32>
    %cst_15 = arith.constant -1.000000e+10 : f32
    %33 = vector.broadcast %cst_15 : f32 to vector<2x8x8xf32>
    %34 = arith.select %22, %33, %32 : vector<2x8x8xi1>, vector<2x8x8xf32>
    %cst_16 = arith.constant dense<0xFF800000> : vector<2x8xf32>
    %35 = vector.multi_reduction <maximumf>, %34, %cst_16 [2] : vector<2x8x8xf32> to vector<2x8xf32>
    %36 = vector.shape_cast %35 : vector<2x8xf32> to vector<2x8x1xf32>
    %37 = vector.broadcast %36 : vector<2x8x1xf32> to vector<2x8x8xf32>
    %38 = arith.subf %34, %37 : vector<2x8x8xf32>
    %39 = math.exp %38 : vector<2x8x8xf32>
    %cst_17 = arith.constant dense<0.000000e+00> : vector<2x8xf32>
    %40 = vector.multi_reduction <add>, %39, %cst_17 [2] : vector<2x8x8xf32> to vector<2x8xf32>
    %41 = vector.shape_cast %40 : vector<2x8xf32> to vector<2x8x1xf32>
    %42 = vector.broadcast %41 : vector<2x8x1xf32> to vector<2x8x8xf32>
    %43 = arith.divf %39, %42 : vector<2x8x8xf32>
    %cst_18 = arith.constant dense<0.000000e+00> : vector<2x8x8xf32>
    %44 = tpu.matmul %43, %29, %cst_18 {dimension_numbers = #tpu.dot_dimension_numbers<[2], [1], [1], [2], [0, 0, 0, 1, 1, 2], [0], [0]>} : vector<2x8x8xf32>, vector<2x8x8xf32>, vector<2x8x8xf32> -> vector<2x8x8xf32>
    %45 = vector.shape_cast %44 : vector<2x8x8xf32> to vector<16x8xf32>
    %c0_19 = arith.constant 0 : index
    %c0_20 = arith.constant 0 : index
    %46 = vector.load %arg5[%c0_19, %c0_20] : memref<32x32xf32, #tpu.memory_space<vmem>>, vector<8x32xf32>
    %cst_21 = arith.constant dense<0.000000e+00> : vector<16x32xf32>
    %47 = tpu.matmul %45, %46, %cst_21 {dimension_numbers = #tpu.dot_dimension_numbers<[1], [0], [0], [1], [0, 0, 1, 1], [], []>} : vector<16x8xf32>, vector<8x32xf32>, vector<16x32xf32> -> vector<16x32xf32>
    %48 = arith.addf %23, %47 : vector<16x32xf32>
    %49 = vector.extract_strided_slice %9 {offsets = [0, 8], sizes = [16, 8], strides = [1, 1]} : vector<16x32xf32> to vector<16x8xf32>
    %50 = vector.shape_cast %49 : vector<16x8xf32> to vector<2x8x8xf32>
    %51 = vector.extract_strided_slice %10 {offsets = [0, 8], sizes = [16, 8], strides = [1, 1]} : vector<16x32xf32> to vector<16x8xf32>
    %52 = vector.shape_cast %51 : vector<16x8xf32> to vector<2x8x8xf32>
    %53 = vector.extract_strided_slice %13 {offsets = [0, 8], sizes = [16, 8], strides = [1, 1]} : vector<16x32xf32> to vector<16x8xf32>
    %54 = vector.shape_cast %53 : vector<16x8xf32> to vector<2x8x8xf32>
    %cst_22 = arith.constant dense<0.000000e+00> : vector<2x8x8xf32>
    %55 = tpu.matmul %50, %52, %cst_22 {dimension_numbers = #tpu.dot_dimension_numbers<[2], [2], [1], [1], [0, 0, 0, 1, 1, 1], [0], [0]>} : vector<2x8x8xf32>, vector<2x8x8xf32>, vector<2x8x8xf32> -> vector<2x8x8xf32>
    %cst_23 = arith.constant 0.353553385 : f32
    %56 = vector.broadcast %cst_23 : f32 to vector<2x8x8xf32>
    %57 = arith.mulf %55, %56 : vector<2x8x8xf32>
    %cst_24 = arith.constant -1.000000e+10 : f32
    %58 = vector.broadcast %cst_24 : f32 to vector<2x8x8xf32>
    %59 = arith.select %22, %58, %57 : vector<2x8x8xi1>, vector<2x8x8xf32>
    %cst_25 = arith.constant dense<0xFF800000> : vector<2x8xf32>
    %60 = vector.multi_reduction <maximumf>, %59, %cst_25 [2] : vector<2x8x8xf32> to vector<2x8xf32>
    %61 = vector.shape_cast %60 : vector<2x8xf32> to vector<2x8x1xf32>
    %62 = vector.broadcast %61 : vector<2x8x1xf32> to vector<2x8x8xf32>
    %63 = arith.subf %59, %62 : vector<2x8x8xf32>
    %64 = math.exp %63 : vector<2x8x8xf32>
    %cst_26 = arith.constant dense<0.000000e+00> : vector<2x8xf32>
    %65 = vector.multi_reduction <add>, %64, %cst_26 [2] : vector<2x8x8xf32> to vector<2x8xf32>
    %66 = vector.shape_cast %65 : vector<2x8xf32> to vector<2x8x1xf32>
    %67 = vector.broadcast %66 : vector<2x8x1xf32> to vector<2x8x8xf32>
    %68 = arith.divf %64, %67 : vector<2x8x8xf32>
    %cst_27 = arith.constant dense<0.000000e+00> : vector<2x8x8xf32>
    %69 = tpu.matmul %68, %54, %cst_27 {dimension_numbers = #tpu.dot_dimension_numbers<[2], [1], [1], [2], [0, 0, 0, 1, 1, 2], [0], [0]>} : vector<2x8x8xf32>, vector<2x8x8xf32>, vector<2x8x8xf32> -> vector<2x8x8xf32>
    %70 = vector.shape_cast %69 : vector<2x8x8xf32> to vector<16x8xf32>
    %c8 = arith.constant 8 : index
    %c0_28 = arith.constant 0 : index
    %71 = vector.load %arg5[%c8, %c0_28] : memref<32x32xf32, #tpu.memory_space<vmem>>, vector<8x32xf32>
    %cst_29 = arith.constant dense<0.000000e+00> : vector<16x32xf32>
    %72 = tpu.matmul %70, %71, %cst_29 {dimension_numbers = #tpu.dot_dimension_numbers<[1], [0], [0], [1], [0, 0, 1, 1], [], []>} : vector<16x8xf32>, vector<8x32xf32>, vector<16x32xf32> -> vector<16x32xf32>
    %73 = arith.addf %48, %72 : vector<16x32xf32>
    %74 = vector.extract_strided_slice %9 {offsets = [0, 16], sizes = [16, 8], strides = [1, 1]} : vector<16x32xf32> to vector<16x8xf32>
    %75 = vector.shape_cast %74 : vector<16x8xf32> to vector<2x8x8xf32>
    %76 = vector.extract_strided_slice %10 {offsets = [0, 16], sizes = [16, 8], strides = [1, 1]} : vector<16x32xf32> to vector<16x8xf32>
    %77 = vector.shape_cast %76 : vector<16x8xf32> to vector<2x8x8xf32>
    %78 = vector.extract_strided_slice %13 {offsets = [0, 16], sizes = [16, 8], strides = [1, 1]} : vector<16x32xf32> to vector<16x8xf32>
    %79 = vector.shape_cast %78 : vector<16x8xf32> to vector<2x8x8xf32>
    %cst_30 = arith.constant dense<0.000000e+00> : vector<2x8x8xf32>
    %80 = tpu.matmul %75, %77, %cst_30 {dimension_numbers = #tpu.dot_dimension_numbers<[2], [2], [1], [1], [0, 0, 0, 1, 1, 1], [0], [0]>} : vector<2x8x8xf32>, vector<2x8x8xf32>, vector<2x8x8xf32> -> vector<2x8x8xf32>
    %cst_31 = arith.constant 0.353553385 : f32
    %81 = vector.broadcast %cst_31 : f32 to vector<2x8x8xf32>
    %82 = arith.mulf %80, %81 : vector<2x8x8xf32>
    %cst_32 = arith.constant -1.000000e+10 : f32
    %83 = vector.broadcast %cst_32 : f32 to vector<2x8x8xf32>
    %84 = arith.select %22, %83, %82 : vector<2x8x8xi1>, vector<2x8x8xf32>
    %cst_33 = arith.constant dense<0xFF800000> : vector<2x8xf32>
    %85 = vector.multi_reduction <maximumf>, %84, %cst_33 [2] : vector<2x8x8xf32> to vector<2x8xf32>
    %86 = vector.shape_cast %85 : vector<2x8xf32> to vector<2x8x1xf32>
    %87 = vector.broadcast %86 : vector<2x8x1xf32> to vector<2x8x8xf32>
    %88 = arith.subf %84, %87 : vector<2x8x8xf32>
    %89 = math.exp %88 : vector<2x8x8xf32>
    %cst_34 = arith.constant dense<0.000000e+00> : vector<2x8xf32>
    %90 = vector.multi_reduction <add>, %89, %cst_34 [2] : vector<2x8x8xf32> to vector<2x8xf32>
    %91 = vector.shape_cast %90 : vector<2x8xf32> to vector<2x8x1xf32>
    %92 = vector.broadcast %91 : vector<2x8x1xf32> to vector<2x8x8xf32>
    %93 = arith.divf %89, %92 : vector<2x8x8xf32>
    %cst_35 = arith.constant dense<0.000000e+00> : vector<2x8x8xf32>
    %94 = tpu.matmul %93, %79, %cst_35 {dimension_numbers = #tpu.dot_dimension_numbers<[2], [1], [1], [2], [0, 0, 0, 1, 1, 2], [0], [0]>} : vector<2x8x8xf32>, vector<2x8x8xf32>, vector<2x8x8xf32> -> vector<2x8x8xf32>
    %95 = vector.shape_cast %94 : vector<2x8x8xf32> to vector<16x8xf32>
    %c16 = arith.constant 16 : index
    %c0_36 = arith.constant 0 : index
    %96 = vector.load %arg5[%c16, %c0_36] : memref<32x32xf32, #tpu.memory_space<vmem>>, vector<8x32xf32>
    %cst_37 = arith.constant dense<0.000000e+00> : vector<16x32xf32>
    %97 = tpu.matmul %95, %96, %cst_37 {dimension_numbers = #tpu.dot_dimension_numbers<[1], [0], [0], [1], [0, 0, 1, 1], [], []>} : vector<16x8xf32>, vector<8x32xf32>, vector<16x32xf32> -> vector<16x32xf32>
    %98 = arith.addf %73, %97 : vector<16x32xf32>
    %99 = vector.extract_strided_slice %9 {offsets = [0, 24], sizes = [16, 8], strides = [1, 1]} : vector<16x32xf32> to vector<16x8xf32>
    %100 = vector.shape_cast %99 : vector<16x8xf32> to vector<2x8x8xf32>
    %101 = vector.extract_strided_slice %10 {offsets = [0, 24], sizes = [16, 8], strides = [1, 1]} : vector<16x32xf32> to vector<16x8xf32>
    %102 = vector.shape_cast %101 : vector<16x8xf32> to vector<2x8x8xf32>
    %103 = vector.extract_strided_slice %13 {offsets = [0, 24], sizes = [16, 8], strides = [1, 1]} : vector<16x32xf32> to vector<16x8xf32>
    %104 = vector.shape_cast %103 : vector<16x8xf32> to vector<2x8x8xf32>
    %cst_38 = arith.constant dense<0.000000e+00> : vector<2x8x8xf32>
    %105 = tpu.matmul %100, %102, %cst_38 {dimension_numbers = #tpu.dot_dimension_numbers<[2], [2], [1], [1], [0, 0, 0, 1, 1, 1], [0], [0]>} : vector<2x8x8xf32>, vector<2x8x8xf32>, vector<2x8x8xf32> -> vector<2x8x8xf32>
    %cst_39 = arith.constant 0.353553385 : f32
    %106 = vector.broadcast %cst_39 : f32 to vector<2x8x8xf32>
    %107 = arith.mulf %105, %106 : vector<2x8x8xf32>
    %cst_40 = arith.constant -1.000000e+10 : f32
    %108 = vector.broadcast %cst_40 : f32 to vector<2x8x8xf32>
    %109 = arith.select %22, %108, %107 : vector<2x8x8xi1>, vector<2x8x8xf32>
    %cst_41 = arith.constant dense<0xFF800000> : vector<2x8xf32>
    %110 = vector.multi_reduction <maximumf>, %109, %cst_41 [2] : vector<2x8x8xf32> to vector<2x8xf32>
    %111 = vector.shape_cast %110 : vector<2x8xf32> to vector<2x8x1xf32>
    %112 = vector.broadcast %111 : vector<2x8x1xf32> to vector<2x8x8xf32>
    %113 = arith.subf %109, %112 : vector<2x8x8xf32>
    %114 = math.exp %113 : vector<2x8x8xf32>
    %cst_42 = arith.constant dense<0.000000e+00> : vector<2x8xf32>
    %115 = vector.multi_reduction <add>, %114, %cst_42 [2] : vector<2x8x8xf32> to vector<2x8xf32>
    %116 = vector.shape_cast %115 : vector<2x8xf32> to vector<2x8x1xf32>
    %117 = vector.broadcast %116 : vector<2x8x1xf32> to vector<2x8x8xf32>
    %118 = arith.divf %114, %117 : vector<2x8x8xf32>
    %cst_43 = arith.constant dense<0.000000e+00> : vector<2x8x8xf32>
    %119 = tpu.matmul %118, %104, %cst_43 {dimension_numbers = #tpu.dot_dimension_numbers<[2], [1], [1], [2], [0, 0, 0, 1, 1, 2], [0], [0]>} : vector<2x8x8xf32>, vector<2x8x8xf32>, vector<2x8x8xf32> -> vector<2x8x8xf32>
    %120 = vector.shape_cast %119 : vector<2x8x8xf32> to vector<16x8xf32>
    %c24 = arith.constant 24 : index
    %c0_44 = arith.constant 0 : index
    %121 = vector.load %arg5[%c24, %c0_44] : memref<32x32xf32, #tpu.memory_space<vmem>>, vector<8x32xf32>
    %cst_45 = arith.constant dense<0.000000e+00> : vector<16x32xf32>
    %122 = tpu.matmul %120, %121, %cst_45 {dimension_numbers = #tpu.dot_dimension_numbers<[1], [0], [0], [1], [0, 0, 1, 1], [], []>} : vector<16x8xf32>, vector<8x32xf32>, vector<16x32xf32> -> vector<16x32xf32>
    %123 = arith.addf %98, %122 : vector<16x32xf32>
    %124 = vector.broadcast %6 : vector<16x1xf32> to vector<16x32xf32>
    %125 = arith.mulf %123, %124 : vector<16x32xf32>
    %cst_46 = arith.constant dense<0.000000e+00> : vector<16xf32>
    %126 = vector.multi_reduction <add>, %125, %cst_46 [1] : vector<16x32xf32> to vector<16xf32>
    %127 = vector.shape_cast %126 : vector<16xf32> to vector<16x1xf32>
    %cst_47 = arith.constant 3.200000e+01 : f32
    %128 = vector.broadcast %cst_47 : f32 to vector<16x1xf32>
    %129 = arith.divf %127, %128 : vector<16x1xf32>
    %130 = vector.broadcast %129 : vector<16x1xf32> to vector<16x32xf32>
    %131 = arith.subf %125, %130 : vector<16x32xf32>
    %132 = arith.mulf %131, %131 : vector<16x32xf32>
    %cst_48 = arith.constant dense<0.000000e+00> : vector<16xf32>
    %133 = vector.multi_reduction <add>, %132, %cst_48 [1] : vector<16x32xf32> to vector<16xf32>
    %134 = vector.shape_cast %133 : vector<16xf32> to vector<16x1xf32>
    %cst_49 = arith.constant 3.200000e+01 : f32
    %135 = vector.broadcast %cst_49 : f32 to vector<16x1xf32>
    %136 = arith.divf %134, %135 : vector<16x1xf32>
    %137 = vector.broadcast %129 : vector<16x1xf32> to vector<16x32xf32>
    %138 = arith.subf %125, %137 : vector<16x32xf32>
    %cst_50 = arith.constant 9.99999974E-6 : f32
    %139 = vector.broadcast %cst_50 : f32 to vector<16x1xf32>
    %140 = arith.addf %136, %139 : vector<16x1xf32>
    %141 = math.rsqrt %140 : vector<16x1xf32>
    %142 = vector.broadcast %141 : vector<16x1xf32> to vector<16x32xf32>
    %143 = arith.mulf %138, %142 : vector<16x32xf32>
    %c0_51 = arith.constant 0 : index
    %c0_52 = arith.constant 0 : index
    %144 = vector.load %arg6[%c0_51, %c0_52] : memref<1x32xf32, #tpu.memory_space<vmem>>, vector<1x32xf32>
    %145 = vector.broadcast %144 : vector<1x32xf32> to vector<16x32xf32>
    %146 = arith.mulf %143, %145 : vector<16x32xf32>
    %c0_53 = arith.constant 0 : index
    %c0_54 = arith.constant 0 : index
    %147 = vector.load %arg7[%c0_53, %c0_54] : memref<1x32xf32, #tpu.memory_space<vmem>>, vector<1x32xf32>
    %148 = vector.broadcast %147 : vector<1x32xf32> to vector<16x32xf32>
    %149 = arith.addf %146, %148 : vector<16x32xf32>
    %c0_55 = arith.constant 0 : index
    %c0_56 = arith.constant 0 : index
    %150 = vector.load %arg8[%c0_55, %c0_56] : memref<32x128xf32, #tpu.memory_space<vmem>>, vector<32x128xf32>
    %cst_57 = arith.constant dense<0.000000e+00> : vector<16x128xf32>
    %151 = tpu.matmul %149, %150, %cst_57 {dimension_numbers = #tpu.dot_dimension_numbers<[1], [0], [0], [1], [0, 0, 1, 1], [], []>} : vector<16x32xf32>, vector<32x128xf32>, vector<16x128xf32> -> vector<16x128xf32>
    %c0_58 = arith.constant 0 : index
    %c0_59 = arith.constant 0 : index
    %152 = vector.load %arg9[%c0_58, %c0_59] : memref<1x128xf32, #tpu.memory_space<vmem>>, vector<1x128xf32>
    %153 = vector.broadcast %152 : vector<1x128xf32> to vector<16x128xf32>
    %154 = arith.addf %151, %153 : vector<16x128xf32>
    %cst_60 = arith.constant 0.000000e+00 : f32
    %155 = vector.broadcast %cst_60 : f32 to vector<16x128xf32>
    %156 = arith.maximumf %154, %155 : vector<16x128xf32>
    %c0_61 = arith.constant 0 : index
    %c0_62 = arith.constant 0 : index
    %157 = vector.load %arg10[%c0_61, %c0_62] : memref<128x32xf32, #tpu.memory_space<vmem>>, vector<128x32xf32>
    %cst_63 = arith.constant dense<0.000000e+00> : vector<16x32xf32>
    %158 = tpu.matmul %156, %157, %cst_63 {dimension_numbers = #tpu.dot_dimension_numbers<[1], [0], [0], [1], [0, 0, 1, 1], [], []>} : vector<16x128xf32>, vector<128x32xf32>, vector<16x32xf32> -> vector<16x32xf32>
    %159 = arith.addf %125, %158 : vector<16x32xf32>
    %c0_64 = arith.constant 0 : index
    %c0_65 = arith.constant 0 : index
    %160 = vector.load %arg11[%c0_64, %c0_65] : memref<1x32xf32, #tpu.memory_space<vmem>>, vector<1x32xf32>
    %161 = vector.broadcast %160 : vector<1x32xf32> to vector<16x32xf32>
    %162 = arith.addf %159, %161 : vector<16x32xf32>
    %163 = vector.shape_cast %162 : vector<16x32xf32> to vector<2x8x32xf32>
    %c0_66 = arith.constant 0 : index
    %c0_67 = arith.constant 0 : index
    %c0_68 = arith.constant 0 : index
    %164 = vector.load %arg12[%c0_66, %c0_67, %c0_68] : memref<2x8x32xf32, #tpu.memory_space<vmem>>, vector<2x8x32xf32>
    tpu.vector_store %arg12[%c0_66, %c0_67, %c0_68], %163 {strides = array<i32>} : memref<2x8x32xf32, #tpu.memory_space<vmem>>, vector<2x8x32xf32>,
    return
  }
  func.func @transform_0(%arg0: i32) -> (i32, i32, i32) {
    %c0_i32 = arith.constant 0 : i32
    %c0_i32_0 = arith.constant 0 : i32
    %c0_i32_1 = arith.constant 0 : i32
    return %arg0, %c0_i32, %c0_i32_0 : i32, i32, i32
  }
  func.func @transform_1(%arg0: i32) -> (i32, i32, i32) {
    %c0_i32 = arith.constant 0 : i32
    %c0_i32_0 = arith.constant 0 : i32
    %c0_i32_1 = arith.constant 0 : i32
    return %arg0, %c0_i32, %c0_i32_0 : i32, i32, i32
  }
  func.func @transform_2(%arg0: i32) -> (i32, i32, i32) {
    %c0_i32 = arith.constant 0 : i32
    %c0_i32_0 = arith.constant 0 : i32
    %c0_i32_1 = arith.constant 0 : i32
    return %arg0, %c0_i32, %c0_i32_0 : i32, i32, i32
  }
  func.func @transform_3(%arg0: i32) -> (i32, i32) {
    %c0_i32 = arith.constant 0 : i32
    %c0_i32_0 = arith.constant 0 : i32
    %c0_i32_1 = arith.constant 0 : i32
    return %c0_i32, %c0_i32_0 : i32, i32
  }
  func.func @transform_4(%arg0: i32) -> (i32, i32) {
    %c0_i32 = arith.constant 0 : i32
    %c0_i32_0 = arith.constant 0 : i32
    %c0_i32_1 = arith.constant 0 : i32
    return %c0_i32, %c0_i32_0 : i32, i32
  }
  func.func @transform_5(%arg0: i32) -> (i32, i32) {
    %c0_i32 = arith.constant 0 : i32
    %c0_i32_0 = arith.constant 0 : i32
    %c0_i32_1 = arith.constant 0 : i32
    return %c0_i32, %c0_i32_0 : i32, i32
  }
  func.func @transform_6(%arg0: i32) -> (i32, i32) {
    %c0_i32 = arith.constant 0 : i32
    %c0_i32_0 = arith.constant 0 : i32
    %c0_i32_1 = arith.constant 0 : i32
    return %c0_i32, %c0_i32_0 : i32, i32
  }
  func.func @transform_7(%arg0: i32) -> (i32, i32) {
    %c0_i32 = arith.constant 0 : i32
    %c0_i32_0 = arith.constant 0 : i32
    %c0_i32_1 = arith.constant 0 : i32
    return %c0_i32, %c0_i32_0 : i32, i32
  }
  func.func @transform_8(%arg0: i32) -> (i32, i32) {
    %c0_i32 = arith.constant 0 : i32
    %c0_i32_0 = arith.constant 0 : i32
    %c0_i32_1 = arith.constant 0 : i32
    return %c0_i32, %c0_i32_0 : i32, i32
  }
  func.func @transform_9(%arg0: i32) -> (i32, i32) {
    %c0_i32 = arith.constant 0 : i32
    %c0_i32_0 = arith.constant 0 : i32
    %c0_i32_1 = arith.constant 0 : i32
    return %c0_i32, %c0_i32_0 : i32, i32
  }
  func.func @transform_10(%arg0: i32) -> (i32, i32) {
    %c0_i32 = arith.constant 0 : i32
    %c0_i32_0 = arith.constant 0 : i32
    %c0_i32_1 = arith.constant 0 : i32
    return %c0_i32, %c0_i32_0 : i32, i32
  }
  func.func @transform_11(%arg0: i32) -> (i32, i32, i32) {
    %c0_i32 = arith.constant 0 : i32
    %c0_i32_0 = arith.constant 0 : i32
    %c0_i32_1 = arith.constant 0 : i32
    return %arg0, %c0_i32, %c0_i32_0 : i32, i32, i32
  }
}

</mosaic_0001>

<bundles_post_ra>
// kernel: tpu_custom_call.1
= control target key start
LH: loop header
LB: loop body
LE: loop exit
PB: predicated region body
PF: predicated region fallthrough
CT: control target
= control target key end

     0   :  { %s1529_s0 = inlined_call_operand.vmem [shape: f32[2,8,32], index: 0, kind: input, shape index: {}]   ;;  %s1530_s1 = inlined_call_operand.vmem [shape: f32[2,1,8], index: 1, kind: input, shape index: {}]   ;;  %s1531_s2 = inlined_call_operand.vmem [shape: f32[2,8,1], index: 2, kind: input, shape index: {}]   ;;  %s1532_s3 = inlined_call_operand.vmem [shape: f32[32,96], index: 3, kind: input, shape index: {}]   ;;  %s1533_s4 = inlined_call_operand.vmem [shape: f32[32,32], index: 4, kind: input, shape index: {}]   ;;  %s1534_s5 = inlined_call_operand.vmem [shape: f32[1,32], index: 5, kind: input, shape index: {}]   ;;  %s1535_s6 = inlined_call_operand.vmem [shape: f32[1,32], index: 6, kind: input, shape index: {}]   ;;  %s1536_s7 = inlined_call_operand.vmem [shape: f32[32,128], index: 7, kind: input, shape index: {}]   ;;  %s1537_s8 = inlined_call_operand.vmem [shape: f32[1,128], index: 8, kind: input, shape index: {}]   ;;  %s1538_s9 = inlined_call_operand.vmem [shape: f32[128,32], index: 9, kind: input, shape index: {}]   ;;  %s1539_s10 = inlined_call_operand.vmem [shape: f32[1,32], index: 10, kind: input, shape index: {}]   ;;  %s1540_s11 = inlined_call_operand.hbm [shape: f32[2,8,32], index: 11, kind: output, shape index: {}]  }
   0x1   :  { %v50_v0 = vld [vmem:[%s1532_s3 + $0x18] sm:$0xff]  ;;  %v49_v1 = vld [vmem:[%s1532_s3 + $0x10] sm:$0xff]  ;;  %v48_v2 = vld [vmem:[%s1532_s3 + $0x8] sm:$0xff] }
   0x2   :  { %70 = vmatpush.msra.mxu0 %v50_v0 }
   0x4   :  { %71 = vmatpush.msra.mxu0 %v49_v1 }
   0x5   :  { %16 = vsyncpa [#allocation3], 0  ;;  %v47_v3 = vld [vmem:[%s1532_s3] sm:$0xff]  ;;  %vm51_vm0 = vcmask 261120   ;;  %v40_v5 = vld [vmem:[%s1529_s0 + $0x8] sm:$0xff]  ;;  %s1168_s29 = smov 88   ;;  %v93_v16 = vlaneseq }
   0x6   :  { %72 = vmatpush.msra.mxu0 %v48_v2  ;;  %v39_v4 = vld [vmem:[%s1529_s0] sm:$0xff]  ;;  %s1169_s3 = smov 96   ;;  %s1170_s30 = smov 120   ;;  %vm113_vm1 = vcmask 64512   ;;  %v1171_v14 = vmov 0   ;;  %v44_v37 = vld [vmem:[%s1531_s2 + $0x8] sm:$0xff] }
   0x7   :  { %1099 = vset.pattern.permute.xlu0 %v1171_v14  ;;  %1098 = vset.pattern.permute.xlu2 %v1171_v14  ;;  %v41_v15 = vld [vmem:[%s1530_s1] sm:$0x1]  ;;  %v94_v18 = vshrl.u32 %v93_v16, 7  ;;  %v96_v19 = vand.u32 127, %v93_v16  ;;  %v42_v21 = vld [vmem:[%s1530_s1 + $0x1] sm:$0x1] }
   0x8   :  { %73 = vmatpush.msra.mxu0 %v47_v3  ;;  %vm98_vm2 = vcmp.gt.f32.partialorder %v41_v15, 0.5  ;;  %vm99_vm6 = vcmp.gt.f32.partialorder %v42_v21, 0.5  ;;  %v46_v39 = vsub.f32 1.0, %v44_v37  ;;  %v43_v40 = vld [vmem:[%s1531_s2] sm:$0xff]  ;;  %s1172_s18 = smov 112   ;;  %s1173_s2 = smov 64  }
   0x9   :  { %1046 = vmatmul.msk.f32.vlgmr.msra.gmra.mxu0 %vm51_vm0, %v39_v4  ;;  %v102_v17 = vsel %vm98_vm2, 1, %v1171_v14  ;;  %vm97_vm3 = vcmp.eq.s32.totalorder %v94_v18, %v96_v19  ;;  %v103_v27 = vsel %vm99_vm6, 1, %v1171_v14  ;;  %v45_v41 = vsub.f32 1.0, %v43_v40  ;;  %s1174_s19 = smov 56   ;;  %s1175_s20 = smov 80  }
   0xa   :  { %v104_v20 = vperm.slane %v102_v17, 0  ;;  %v105_v29 = vperm.slane %v103_v27, 0  ;;  %s1176_s21 = smov 72   ;;  %s1177_s26 = smov 48  }
   0xb   :  { %s1178_s27 = smov 104  }
   0xc   :  { %vm106_vm4 = vcmp.eq.s32.totalorder %v104_v20, 1  ;;  %vm107_vm7 = vcmp.eq.s32.totalorder %v105_v29, 1 }
   0xd   :  { %vm1291_vm5 = vmor %vm97_vm3, %vm106_vm4 }
   0xe   :  { %vm1302_vm8 = vmor %vm97_vm3, %vm107_vm7 }
  0x11   :  { %1047 = vmatmul.msk.f32.gmra.mxu0 %vm51_vm0, %v40_v5 }
  0x86   :  { %v1264_v6 = vpop.f32.mrf.mxu0 }
  0x87   :  { %274 = vrot.lane.b32.xlu1 %v1264_v6, %s1168_s29  ;;  %111 = vrot.lane.b32.xlu0 %v1264_v6, %s1169_s3 }
  0x8e   :  { %v1268_v7 = vpop.f32.mrf.mxu0 }
  0x8f   :  { %272 = vrot.lane.b32.xlu1 %v1264_v6, %s1170_s30  ;;  %302 = vrot.lane.b32.xlu2 %v1268_v7, %s1168_s29  ;;  %s1034_s29 = sshll.u32 %s1540_s11, 4  ;;  %s1035_s29 = int_to_ptr.hbm [resolvable:$true] %s1034_s29 }
  0x90   :  { %139 = vrot.lane.b32.xlu0 %v1268_v7, %s1169_s3  ;;  %s1179_s3 = smov 40  }
  0x97   :  { %300 = vrot.lane.b32.xlu2 %v1268_v7, %s1170_s30 }
  0xe9   :  { %v303_v11 = vpop.permute.xlu2 %302 }
  0xf1   :  { %v301_v13 = vpop.permute.xlu2 %300 }
  0xf9   :  { %v275_v8 = vpop.permute.xlu1 %274  ;;  %v112_v9 = vpop.permute.xlu0 %111 }
  0xfa   :  { %1048 = vmatpush.xpose.msk.msra.mxu1 %vm113_vm1, %v112_v9 }
  0xfd   :  { %1049 = vmatmul.msk.f32.vlgmr.msra.gmra.mxu1 %vm113_vm1, %v1264_v6 }
  0xfe   :  { %1054 = vmatpush.xpose.msk.msrb.mxu1 %vm113_vm1, %v275_v8 }
 0x101   :  { %v273_v12 = vpop.permute.xlu1 %272 }
 0x102   :  { %v140_v10 = vpop.permute.xlu0 %139 }
 0x103   :  { %1050 = vmatpush.xpose.msk.msra.mxu2 %vm113_vm1, %v140_v10 }
 0x105   :  { %1055 = vmatmul.msk.f32.vlgmr.msrb.gmra.mxu1 %vm113_vm1, %v273_v12 }
 0x106   :  { %1051 = vmatmul.msk.f32.vlgmr.msra.gmra.mxu2 %vm113_vm1, %v1268_v7 }
 0x107   :  { %1056 = vmatpush.xpose.msk.msrb.mxu2 %vm113_vm1, %v303_v11 }
 0x10e   :  { %1057 = vmatmul.msk.f32.vlgmr.msrb.gmra.mxu2 %vm113_vm1, %v301_v13 }
 0x17a   :  { %v135_v22 = vpop.f32.mrf.mxu1 }
 0x17b   :  { %v165_v24 = vmul.f32 0.35355338, %v135_v22 }
 0x17d   :  { %v167_v25 = vsel %vm1291_vm5, -1e+10, %v165_v24 }
 0x17e   :  { %v169_v26 = vsel %vm113_vm1, %v167_v25, -inf }
 0x17f   :  { %170 = vmax.xlane.f32.xlu0 %v169_v26 }
 0x182   :  { %v297_v28 = vpop.f32.mrf.mxu1 }
 0x183   :  { %v328_v30 = vmul.f32 0.35355338, %v297_v28 }
 0x185   :  { %v330_v31 = vsel %vm1291_vm5, -1e+10, %v328_v30 }
 0x186   :  { %v332_v32 = vsel %vm113_vm1, %v330_v31, -inf }
 0x187   :  { %333 = vmax.xlane.f32.xlu2 %v332_v32 }
 0x189   :  { %v162_v33 = vpop.f32.mrf.mxu2 }
 0x18a   :  { %v166_v35 = vmul.f32 0.35355338, %v162_v33 }
 0x18c   :  { %v168_v36 = vsel %vm1302_vm8, -1e+10, %v166_v35 }
 0x18d   :  { %v172_v38 = vsel %vm113_vm1, %v168_v36, -inf }
 0x18e   :  { %173 = vmax.xlane.f32.xlu1 %v172_v38 }
 0x191   :  { %v325_v61 = vpop.f32.mrf.mxu2 }
 0x192   :  { %v329_v62 = vmul.f32 0.35355338, %v325_v61 }
 0x193   :  { %88 = vperm.xlu0 %1099, %v46_v39  }
 0x194   :  { %v1346_v63 = vsel %vm1302_vm8, -1e+10, %v329_v62 }
 0x195   :  { %v335_v0 = vsel %vm113_vm1, %v1346_v63, -inf }
 0x19b   :  { %491 = vrot.lane.b32.xlu0 %v1264_v6, %s1172_s18 }
 0x19f   :  { %83 = vperm.xlu2 %1098, %v45_v41  }
 0x1f2   :  { %v171_v42 = vpop.xlane.xlu0 %170 }
 0x1f3   :  { %v175_v43 = vsub.f32 %v167_v25, %v171_v42 }
 0x1f5   :  { %v177_v44 = vmul.f32 1.442695, %v175_v43 }
 0x1f7   :  { %1104 = vpow2.f32 %v177_v44 }
 0x1fa   :  { %v334_v45 = vpop.xlane.xlu2 %333 }
 0x1fb   :  { %v338_v46 = vsub.f32 %v330_v31, %v334_v45 }
 0x1fd   :  { %v1105_v47 = vpop.eup %1104  ;;  %v340_v48 = vmul.f32 1.442695, %v338_v46 }
 0x1fe   :  { %v181_v49 = vsel %vm113_vm1, %v1105_v47, 0.0 }
 0x1ff   :  { %1106 = vpow2.f32 %v340_v48  ;;  %182 = vadd.xlane.f32.xlu1 %v181_v49 }
 0x201   :  { %v174_v50 = vpop.xlane.xlu1 %173 }
 0x202   :  { %v176_v51 = vsub.f32 %v168_v36, %v174_v50  ;;  %v1318_v52 = vpop.permute.xlu2 %83 }
 0x203   :  { %v1322_v53 = vmul.f32 %v1318_v52, %v1264_v6 }
 0x204   :  { %v179_v54 = vmul.f32 1.442695, %v176_v51 }
 0x205   :  { %v1324_v55 = vpop.eup %1106  ;;  %218 = vrot.lane.b32.xlu2 %v1322_v53, %s1173_s2  ;;  %v1336_v59 = vpop.permute.xlu0 %88 }
 0x206   :  { %1108 = vpow2.f32 %v179_v54  ;;  %v344_v56 = vsel %vm113_vm1, %v1324_v55, 0.0  ;;  %v1340_v60 = vmul.f32 %v1336_v59, %v1268_v7  ;;  %v432_v54 = vld [vmem:[%s1533_s4 + $0x8] sm:$0xff] }
 0x207   :  { %345 = vadd.xlane.f32.xlu1 %v344_v56  ;;  %454 = vmatpush.msrb.mxu0 %v432_v54 }
 0x20c   :  { %v1329_v57 = vpop.eup %1108 }
 0x20d   :  { %380 = vrot.lane.b32.xlu2 %v1322_v53, %s1174_s19  ;;  %v184_v58 = vsel %vm113_vm1, %v1329_v57, 0.0  ;;  %v492_v46 = vpop.permute.xlu0 %491 }
 0x20f   :  { %185 = vadd.xlane.f32.xlu1 %v184_v58 }
 0x215   :  { %493 = vrot.lane.b32.xlu2 %v1264_v6, %s1175_s20 }
 0x228   :  { %245 = vrot.lane.b32.xlu1 %v1340_v60, %s1173_s2 }
 0x230   :  { %406 = vrot.lane.b32.xlu1 %v1340_v60, %s1174_s19 }
 0x23e   :  { %336 = vmax.xlane.f32.xlu2 %v335_v0 }
 0x256   :  { %519 = vrot.lane.b32.xlu2 %v1268_v7, %s1172_s18 }
 0x25f   :  { %v219_v1 = vpop.permute.xlu2 %218 }
 0x260   :  { %239 = vmatpush.msra.mxu3 %v219_v1 }
 0x267   :  { %v381_v29 = vpop.permute.xlu2 %380 }
 0x26f   :  { %v494_v41 = vpop.permute.xlu2 %493 }
 0x272   :  { %v183_v2 = vpop.xlane.xlu1 %182 }
 0x273   :  { %1110 = vrcp.f32 %v183_v2  ;;  %v198_v10 = vand.u32 2147483648, %v183_v2  ;;  %v196_v11 = vand.u32 2147483647, %v183_v2  ;;  %vm192_vm10 = vweird.f32 %v183_v2 }
 0x275   :  { %v199_v13 = vor.u32 1.1754944e-38, %v198_v10  ;;  %vm197_vm12 = vcmp.eq.f32.partialorder %v196_v11, 8.507059e+37 }
 0x279   :  { %v1111_v3 = vpop.eup %1110 }
 0x27a   :  { %v188_v4 = vmul.f32 %v1111_v3, %v183_v2  ;;  %v346_v5 = vpop.xlane.xlu1 %345  ;;  %vm193_vm9 = vweird.f32 %v1111_v3 }
 0x27b   :  { %vm194_vm11 = vmor %vm192_vm10, %vm193_vm9  ;;  %1112 = vrcp.f32 %v346_v5  ;;  %v361_v36 = vand.u32 2147483648, %v346_v5  ;;  %vm355_vm4 = vweird.f32 %v346_v5  ;;  %v359_v37 = vand.u32 2147483647, %v346_v5 }
 0x27c   :  { %v189_v8 = vsub.f32 1.0, %v188_v4 }
 0x27d   :  { %v362_v42 = vor.u32 1.1754944e-38, %v361_v36  ;;  %vm360_vm7 = vcmp.eq.f32.partialorder %v359_v37, 8.507059e+37 }
 0x27e   :  { %v190_v9 = vmul.f32 %v1111_v3, %v189_v8 }
 0x280   :  { %v191_v12 = vadd.f32 %v1111_v3, %v190_v9 }
 0x281   :  { %v1113_v18 = vpop.eup %1112 }
 0x282   :  { %v186_v14 = vpop.xlane.xlu1 %185  ;;  %v195_v15 = vsel %vm194_vm11, %v1111_v3, %v191_v12  ;;  %v351_v21 = vmul.f32 %v1113_v18, %v346_v5  ;;  %vm356_vm3 = vweird.f32 %v1113_v18 }
 0x283   :  { %1114 = vrcp.f32 %v186_v14  ;;  %v200_v16 = vsel %vm197_vm12, %v199_v13, %v195_v15  ;;  %v213_v27 = vand.u32 2147483648, %v186_v14  ;;  %vm207_vm14 = vweird.f32 %v186_v14  ;;  %vm357_vm6 = vmor %vm355_vm4, %vm356_vm3 }
 0x284   :  { %v201_v17 = vmul.f32 %v1105_v47, %v200_v16  ;;  %v352_v25 = vsub.f32 1.0, %v351_v21  ;;  %v211_v28 = vand.u32 2147483647, %v186_v14 }
 0x285   :  { %v214_v32 = vor.u32 1.1754944e-38, %v213_v27 }
 0x286   :  { %1052 = vmatmul.msk.f32.vlgmr.msra.gmra.mxu3 %vm113_vm1, %v201_v17  ;;  %v353_v30 = vmul.f32 %v1113_v18, %v352_v25  ;;  %vm212_vm2 = vcmp.eq.f32.partialorder %v211_v28, 8.507059e+37 }
 0x288   :  { %v354_v35 = vadd.f32 %v1113_v18, %v353_v30 }
 0x289   :  { %v1115_v19 = vpop.eup %1114 }
 0x28a   :  { %v203_v20 = vmul.f32 %v1115_v19, %v186_v14  ;;  %vm208_vm13 = vweird.f32 %v1115_v19  ;;  %v358_v40 = vsel %vm357_vm6, %v1113_v18, %v354_v35 }
 0x28b   :  { %vm209_vm15 = vmor %vm207_vm14, %vm208_vm13  ;;  %v363_v43 = vsel %vm360_vm7, %v362_v42, %v358_v40 }
 0x28c   :  { %v204_v22 = vsub.f32 1.0, %v203_v20  ;;  %v364_v45 = vmul.f32 %v1324_v55, %v363_v43 }
 0x28e   :  { %v205_v24 = vmul.f32 %v1115_v19, %v204_v22 }
 0x290   :  { %v206_v26 = vadd.f32 %v1115_v19, %v205_v24 }
 0x292   :  { %v210_v31 = vsel %vm209_vm15, %v1115_v19, %v206_v26 }
 0x293   :  { %v215_v33 = vsel %vm212_vm2, %v214_v32, %v210_v31 }
 0x294   :  { %v216_v39 = vmul.f32 %v1329_v57, %v215_v33  ;;  %v271_v57 = vld [vmem:[%s1533_s4] sm:$0xff] }
 0x295   :  { %483 = vmatpush.msra.mxu0 %v271_v57 }
 0x29a   :  { %v246_v38 = vpop.permute.xlu1 %245 }
 0x29b   :  { %266 = vmatpush.msrb.mxu3 %v246_v38 }
 0x29c   :  { %1053 = vmatmul.msk.f32.vlgmr.msrb.gmra.mxu3 %vm113_vm1, %v216_v39 }
 0x29d   :  { %401 = vmatpush.msra.mxu3 %v381_v29 }
 0x29f   :  { %1064 = vmatpush.xpose.msk.msrb.mxu3 %vm113_vm1, %v494_v41 }
 0x2a2   :  { %v407_v44 = vpop.permute.xlu1 %406 }
 0x2a3   :  { %427 = vmatpush.msra.mxu1 %v407_v44 }
 0x2a4   :  { %1058 = vmatmul.msk.f32.vlgmr.msra.gmra.mxu3 %vm113_vm1, %v364_v45 }
 0x2ac   :  { %1065 = vmatmul.msk.f32.vlgmr.msrb.gmra.mxu3 %vm113_vm1, %v492_v46 }
 0x2b1   :  { %v337_v47 = vpop.xlane.xlu2 %336 }
 0x2b2   :  { %v339_v48 = vsub.f32 %v1346_v63, %v337_v47 }
 0x2b4   :  { %v342_v49 = vmul.f32 1.442695, %v339_v48 }
 0x2b6   :  { %1116 = vpow2.f32 %v342_v49 }
 0x2b9   :  { %v520_v16 = vpop.permute.xlu2 %519 }
 0x2bc   :  { %v1117_v50 = vpop.eup %1116 }
 0x2bd   :  { %v347_v51 = vsel %vm113_vm1, %v1117_v50, 0.0 }
 0x2be   :  { %348 = vadd.xlane.f32.xlu0 %v347_v51 }
 0x2d2   :  { %521 = vrot.lane.b32.xlu0 %v1268_v7, %s1175_s20 }
 0x2da   :  { %685 = vrot.lane.b32.xlu0 %v1264_v6, %s1176_s21 }
 0x2e2   :  { %713 = vrot.lane.b32.xlu0 %v1268_v7, %s1176_s21 }
 0x309   :  { %v241_v55 = vpop.f32.mrf.mxu3 }
 0x31f   :  { %v268_v56 = vpop.f32.mrf.mxu3 }
 0x327   :  { %v403_v58 = vpop.f32.mrf.mxu3 }
 0x328   :  { %1060 = vmatmul.msk.f32.vlgmr.msrb.gmra.mxu0 %vm113_vm1, %v403_v58 }
 0x32f   :  { %v516_v61 = vpop.f32.mrf.mxu3 }
 0x330   :  { %v547_v62 = vmul.f32 0.35355338, %v516_v61 }
 0x331   :  { %v349_v63 = vpop.xlane.xlu0 %348 }
 0x332   :  { %1118 = vrcp.f32 %v349_v63  ;;  %v549_v0 = vsel %vm1291_vm5, -1e+10, %v547_v62  ;;  %v376_v5 = vand.u32 2147483648, %v349_v63  ;;  %v374_v9 = vand.u32 2147483647, %v349_v63 }
 0x333   :  { %v551_v1 = vsel %vm113_vm1, %v549_v0, -inf  ;;  %vm370_vm10 = vweird.f32 %v349_v63 }
 0x334   :  { %552 = vmax.xlane.f32.xlu1 %v551_v1  ;;  %v377_v11 = vor.u32 1.1754944e-38, %v376_v5  ;;  %vm375_vm12 = vcmp.eq.f32.partialorder %v374_v9, 8.507059e+37 }
 0x338   :  { %v1119_v2 = vpop.eup %1118 }
 0x339   :  { %v366_v3 = vmul.f32 %v1119_v2, %v349_v63  ;;  %vm371_vm9 = vweird.f32 %v1119_v2 }
 0x33a   :  { %vm372_vm11 = vmor %vm370_vm10, %vm371_vm9 }
 0x33b   :  { %v367_v4 = vsub.f32 1.0, %v366_v3 }
 0x33d   :  { %v368_v8 = vmul.f32 %v1119_v2, %v367_v4 }
 0x33f   :  { %v369_v10 = vadd.f32 %v1119_v2, %v368_v8 }
 0x341   :  { %v373_v12 = vsel %vm372_vm11, %v1119_v2, %v369_v10 }
 0x342   :  { %v378_v13 = vsel %vm375_vm12, %v377_v11, %v373_v12 }
 0x343   :  { %v379_v14 = vmul.f32 %v1117_v50, %v378_v13 }
 0x344   :  { %v522_v15 = vpop.permute.xlu0 %521 }
 0x345   :  { %1059 = vmatmul.msk.f32.vlgmr.msra.gmra.mxu1 %vm113_vm1, %v379_v14 }
 0x346   :  { %1066 = vmatpush.xpose.msk.msrb.mxu1 %vm113_vm1, %v522_v15 }
 0x34c   :  { %v686_v17 = vpop.permute.xlu0 %685 }
 0x34d   :  { %1067 = vmatmul.msk.f32.vlgmr.msrb.gmra.mxu1 %vm113_vm1, %v520_v16  ;;  %1072 = vmatpush.xpose.msk.msrb.mxu0 %vm113_vm1, %v686_v17 }
 0x34e   :  { %599 = vrot.lane.b32.xlu1 %v1322_v53, %s1177_s26 }
 0x354   :  { %v714_v25 = vpop.permute.xlu0 %713 }
 0x356   :  { %711 = vrot.lane.b32.xlu1 %v1268_v7, %s1178_s27 }
 0x3a5   :  { %v456_v40 = vpop.f32.mrf.mxu0 }
 0x3a7   :  { %v553_v18 = vpop.xlane.xlu1 %552 }
 0x3a8   :  { %v557_v19 = vsub.f32 %v549_v0, %v553_v18 }
 0x3aa   :  { %v559_v20 = vmul.f32 1.442695, %v557_v19 }
 0x3ac   :  { %1120 = vpow2.f32 %v559_v20 }
 0x3b2   :  { %v1121_v21 = vpop.eup %1120 }
 0x3b3   :  { %v563_v22 = vsel %vm113_vm1, %v1121_v21, 0.0 }
 0x3b4   :  { %564 = vadd.xlane.f32.xlu2 %v563_v22 }
 0x3c0   :  { %v600_v24 = vpop.permute.xlu1 %599 }
 0x3c1   :  { %620 = vmatpush.msra.mxu3 %v600_v24 }
 0x3c2   :  { %v429_v26 = vpop.f32.mrf.mxu1 }
 0x3c3   :  { %1074 = vmatpush.xpose.msk.msrb.mxu3 %vm113_vm1, %v714_v25  ;;  %1061 = vmatmul.msk.f32.gmra.mxu0 %vm113_vm1, %v429_v26 }
 0x3c8   :  { %v712_v46 = vpop.permute.xlu1 %711 }
 0x3ca   :  { %v544_v27 = vpop.f32.mrf.mxu1 }
 0x3cb   :  { %v548_v28 = vmul.f32 0.35355338, %v544_v27  ;;  %1062 = vmatmul.msk.f32.vlgmr.msra.gmra.mxu0 %vm113_vm1, %v241_v55  ;;  %v651_v55 = vld [vmem:[%s1533_s4 + $0x10] sm:$0xff] }
 0x3cc   :  { %683 = vrot.lane.b32.xlu2 %v1264_v6, %s1178_s27  ;;  %673 = vmatpush.msra.mxu2 %v651_v55 }
 0x3cd   :  { %v550_v7 = vsel %vm1302_vm8, -1e+10, %v548_v28 }
 0x3ce   :  { %v554_v29 = vsel %vm113_vm1, %v550_v7, -inf }
 0x3cf   :  { %555 = vmax.xlane.f32.xlu0 %v554_v29 }
 0x3d3   :  { %1063 = vmatmul.msk.f32.gmra.mxu0 %vm113_vm1, %v268_v56 }
 0x427   :  { %v565_v30 = vpop.xlane.xlu2 %564 }
 0x428   :  { %1122 = vrcp.f32 %v565_v30  ;;  %v580_v36 = vand.u32 2147483648, %v565_v30  ;;  %v578_v6 = vand.u32 2147483647, %v565_v30  ;;  %vm574_vm14 = vweird.f32 %v565_v30 }
 0x42a   :  { %v581_v39 = vor.u32 1.1754944e-38, %v580_v36  ;;  %vm579_vm2 = vcmp.eq.f32.partialorder %v578_v6, 8.507059e+37 }
 0x42e   :  { %v1123_v31 = vpop.eup %1122 }
 0x42f   :  { %v570_v32 = vmul.f32 %v1123_v31, %v565_v30  ;;  %v684_v33 = vpop.permute.xlu2 %683  ;;  %vm575_vm13 = vweird.f32 %v1123_v31 }
 0x430   :  { %1073 = vmatmul.msk.f32.vlgmr.msrb.gmra.mxu0 %vm113_vm1, %v684_v33  ;;  %vm576_vm15 = vmor %vm574_vm14, %vm575_vm13 }
 0x431   :  { %v571_v35 = vsub.f32 1.0, %v570_v32 }
 0x433   :  { %v572_v37 = vmul.f32 %v1123_v31, %v571_v35 }
 0x435   :  { %v573_v38 = vadd.f32 %v1123_v31, %v572_v37 }
 0x437   :  { %v577_v41 = vsel %vm576_vm15, %v1123_v31, %v573_v38 }
 0x438   :  { %v582_v42 = vsel %vm579_vm2, %v581_v39, %v577_v41 }
 0x439   :  { %v583_v43 = vmul.f32 %v1121_v21, %v582_v42 }
 0x43b   :  { %1068 = vmatmul.msk.f32.vlgmr.msra.gmra.mxu3 %vm113_vm1, %v583_v43 }
 0x440   :  { %v1393_v44 = vpop.f32.mrf.mxu0 }
 0x442   :  { %v556_v45 = vpop.xlane.xlu0 %555 }
 0x443   :  { %v558_v47 = vsub.f32 %v550_v7, %v556_v45  ;;  %1075 = vmatmul.msk.f32.vlgmr.msrb.gmra.mxu3 %vm113_vm1, %v712_v46 }
 0x445   :  { %v561_v48 = vmul.f32 1.442695, %v558_v47 }
 0x447   :  { %1124 = vpow2.f32 %v561_v48 }
 0x448   :  { %v485_v49 = vpop.f32.mrf.mxu0 }
 0x449   :  { %v1396_v50 = vadd.f32 %v485_v49, %v456_v40 }
 0x44d   :  { %v1125_v51 = vpop.eup %1124 }
 0x44e   :  { %v566_v54 = vsel %vm113_vm1, %v1125_v51, 0.0 }
 0x44f   :  { %567 = vadd.xlane.f32.xlu0 %v566_v54 }
 0x450   :  { %v1404_v56 = vpop.f32.mrf.mxu0 }
 0x463   :  { %625 = vrot.lane.b32.xlu0 %v1340_v60, %s1177_s26 }
 0x4ad   :  { %v708_v57 = vpop.f32.mrf.mxu0 }
 0x4ae   :  { %v739_v58 = vmul.f32 0.35355338, %v708_v57  ;;  %v843_v57 = vld [vmem:[%s1533_s4 + $0x18] sm:$0xff] }
 0x4af   :  { %865 = vmatpush.msra.mxu3 %v843_v57  ;;  %v986_v57 = vld [vmem:[%s1538_s9 + $0x38] sm:$0xff] }
 0x4b0   :  { %v741_v61 = vsel %vm1291_vm5, -1e+10, %v739_v58 }
 0x4b1   :  { %v743_v62 = vsel %vm113_vm1, %v741_v61, -inf }
 0x4b2   :  { %744 = vmax.xlane.f32.xlu2 %v743_v62 }
 0x4be   :  { %v622_v63 = vpop.f32.mrf.mxu3 }
 0x4bf   :  { %1070 = vmatmul.msk.f32.vlgmr.msra.gmra.mxu2 %vm113_vm1, %v622_v63 }
 0x4c2   :  { %v568_v0 = vpop.xlane.xlu0 %567 }
 0x4c3   :  { %1126 = vrcp.f32 %v568_v0  ;;  %v595_v23 = vand.u32 2147483648, %v568_v0  ;;  %v593_v11 = vand.u32 2147483647, %v568_v0  ;;  %vm589_vm3 = vweird.f32 %v568_v0 }
 0x4c5   :  { %v596_v13 = vor.u32 1.1754944e-38, %v595_v23  ;;  %vm594_vm6 = vcmp.eq.f32.partialorder %v593_v11, 8.507059e+37 }
 0x4c6   :  { %v736_v1 = vpop.f32.mrf.mxu3 }
 0x4c7   :  { %v740_v2 = vmul.f32 0.35355338, %v736_v1 }
 0x4c9   :  { %v1127_v3 = vpop.eup %1126  ;;  %v742_v5 = vsel %vm1302_vm8, -1e+10, %v740_v2 }
 0x4ca   :  { %v585_v4 = vmul.f32 %v1127_v3, %v568_v0  ;;  %v746_v8 = vsel %vm113_vm1, %v742_v5, -inf  ;;  %vm590_vm5 = vweird.f32 %v1127_v3 }
 0x4cb   :  { %747 = vmax.xlane.f32.xlu1 %v746_v8  ;;  %vm591_vm4 = vmor %vm589_vm3, %vm590_vm5 }
 0x4cc   :  { %v586_v9 = vsub.f32 1.0, %v585_v4 }
 0x4ce   :  { %v587_v10 = vmul.f32 %v1127_v3, %v586_v9 }
 0x4d0   :  { %v588_v12 = vadd.f32 %v1127_v3, %v587_v10 }
 0x4d2   :  { %v592_v14 = vsel %vm591_vm4, %v1127_v3, %v588_v12 }
 0x4d3   :  { %v597_v15 = vsel %vm594_vm6, %v596_v13, %v592_v14 }
 0x4d4   :  { %v598_v16 = vmul.f32 %v1125_v51, %v597_v15 }
 0x4d5   :  { %v626_v17 = vpop.permute.xlu0 %625 }
 0x4d6   :  { %646 = vmatpush.msra.mxu1 %v626_v17 }
 0x4d7   :  { %1069 = vmatmul.msk.f32.vlgmr.msra.gmra.mxu1 %vm113_vm1, %v598_v16 }
 0x525   :  { %v745_v34 = vpop.xlane.xlu2 %744 }
 0x526   :  { %v749_v18 = vsub.f32 %v741_v61, %v745_v34 }
 0x528   :  { %v751_v19 = vmul.f32 1.442695, %v749_v18 }
 0x52a   :  { %1128 = vpow2.f32 %v751_v19 }
 0x530   :  { %v1129_v20 = vpop.eup %1128 }
 0x531   :  { %v755_v21 = vsel %vm113_vm1, %v1129_v20, 0.0 }
 0x532   :  { %756 = vadd.xlane.f32.xlu2 %v755_v21 }
 0x53e   :  { %v748_v22 = vpop.xlane.xlu1 %747 }
 0x53f   :  { %v750_v24 = vsub.f32 %v742_v5, %v748_v22  ;;  %v489_v5 = vadd.f32 %v1404_v56, %v1393_v44 }
 0x541   :  { %v753_v25 = vmul.f32 1.442695, %v750_v24  ;;  %v943_v24 = vld [vmem:[%s1536_s7 + $0x18] sm:$0xff] }
 0x542   :  { %v675_v62 = vpop.f32.mrf.mxu2 }
 0x543   :  { %1130 = vpow2.f32 %v753_v25  ;;  %v681_v63 = vadd.f32 %v675_v62, %v1396_v50  ;;  %v942_v25 = vld [vmem:[%s1536_s7 + $0x10] sm:$0xff] }
 0x549   :  { %v1131_v26 = vpop.eup %1130 }
 0x54a   :  { %791 = vrot.lane.b32.xlu2 %v1322_v53, %s1179_s3  ;;  %v758_v27 = vsel %vm113_vm1, %v1131_v26, 0.0 }
 0x54b   :  { %759 = vadd.xlane.f32.xlu1 %v758_v27  ;;  %v940_v27 = vld [vmem:[%s1536_s7] sm:$0xff] }
 0x554   :  { %v648_v28 = vpop.f32.mrf.mxu1 }
 0x555   :  { %1071 = vmatmul.msk.f32.gmra.mxu2 %vm113_vm1, %v648_v28 }
 0x564   :  { %817 = vrot.lane.b32.xlu1 %v1340_v60, %s1179_s3  ;;  %s1183_s3 = smov 8  }
 0x5a5   :  { %v757_v7 = vpop.xlane.xlu2 %756 }
 0x5a6   :  { %1132 = vrcp.f32 %v757_v7  ;;  %v772_v33 = vand.u32 2147483648, %v757_v7  ;;  %v770_v36 = vand.u32 2147483647, %v757_v7  ;;  %vm766_vm7 = vweird.f32 %v757_v7 }
 0x5a8   :  { %v773_v37 = vor.u32 1.1754944e-38, %v772_v33  ;;  %vm771_vm10 = vcmp.eq.f32.partialorder %v770_v36, 8.507059e+37 }
 0x5ac   :  { %v1133_v29 = vpop.eup %1132 }
 0x5ad   :  { %v762_v30 = vmul.f32 %v1133_v29, %v757_v7  ;;  %v792_v31 = vpop.permute.xlu2 %791  ;;  %vm767_vm8 = vweird.f32 %v1133_v29 }
 0x5ae   :  { %812 = vmatpush.msrb.mxu1 %v792_v31  ;;  %vm768_vm9 = vmor %vm766_vm7, %vm767_vm8 }
 0x5af   :  { %v763_v32 = vsub.f32 1.0, %v762_v30 }
 0x5b0   :  { %966 = vmatpush.msra.mxu1 %v943_v24 }
 0x5b1   :  { %v764_v35 = vmul.f32 %v1133_v29, %v763_v32 }
 0x5b2   :  { %967 = vmatpush.msra.mxu1 %v942_v25 }
 0x5b3   :  { %v765_v53 = vadd.f32 %v1133_v29, %v764_v35 }
 0x5b5   :  { %v769_v6 = vsel %vm768_vm9, %v1133_v29, %v765_v53  ;;  %v1100_v53 = vld [vmem:[%s1534_s5] ss:$0 sm:$0xff] }
 0x5b6   :  { %v774_v38 = vsel %vm771_vm10, %v773_v37, %v769_v6 }
 0x5b7   :  { %v775_v39 = vmul.f32 %v1129_v20, %v774_v38  ;;  %v1101_v38 = vld [vmem:[%s1535_s6] ss:$0 sm:$0xff] }
 0x5b9   :  { %1076 = vmatmul.msk.f32.vlgmr.msrb.gmra.mxu1 %vm113_vm1, %v775_v39 }
 0x5be   :  { %v760_v60 = vpop.xlane.xlu1 %759 }
 0x5bf   :  { %1134 = vrcp.f32 %v760_v60  ;;  %v787_v46 = vand.u32 2147483648, %v760_v60  ;;  %vm781_vm12 = vweird.f32 %v760_v60  ;;  %v785_v47 = vand.u32 2147483647, %v760_v60 }
 0x5c1   :  { %v788_v49 = vor.u32 1.1754944e-38, %v787_v46  ;;  %vm786_vm14 = vcmp.eq.f32.partialorder %v785_v47, 8.507059e+37  ;;  %v991_v46 = vld [vmem:[%s1538_s9 + $0x60] sm:$0xff] }
 0x5c5   :  { %v1135_v40 = vpop.eup %1134 }
 0x5c6   :  { %v777_v41 = vmul.f32 %v1135_v40, %v760_v60  ;;  %vm782_vm11 = vweird.f32 %v1135_v40 }
 0x5c7   :  { %vm783_vm13 = vmor %vm781_vm12, %vm782_vm11 }
 0x5c8   :  { %v778_v42 = vsub.f32 1.0, %v777_v41  ;;  %v993_v41 = vld [vmem:[%s1538_s9 + $0x70] sm:$0xff] }
 0x5ca   :  { %v779_v43 = vmul.f32 %v1135_v40, %v778_v42  ;;  %v992_v42 = vld [vmem:[%s1538_s9 + $0x68] sm:$0xff] }
 0x5cc   :  { %v780_v45 = vadd.f32 %v1135_v40, %v779_v43 }
 0x5ce   :  { %v784_v48 = vsel %vm783_vm13, %v1135_v40, %v780_v45  ;;  %v994_v40 = vld [vmem:[%s1538_s9 + $0x78] sm:$0xff] }
 0x5cf   :  { %v789_v51 = vsel %vm786_vm14, %v788_v49, %v784_v48  ;;  %995 = vmatpush.msrb.mxu2 %v994_v40  ;;  %v990_v48 = vld [vmem:[%s1538_s9 + $0x58] sm:$0xff]  ;;  %v989_v49 = vld [vmem:[%s1538_s9 + $0x50] sm:$0xff] }
 0x5d0   :  { %v790_v55 = vmul.f32 %v1131_v26, %v789_v51  ;;  %v941_v26 = vld [vmem:[%s1536_s7 + $0x8] sm:$0xff] }
 0x5d1   :  { %968 = vmatpush.msra.mxu1 %v941_v26  ;;  %996 = vmatpush.msrb.mxu2 %v993_v41  ;;  %v988_v51 = vld [vmem:[%s1538_s9 + $0x48] sm:$0xff] }
 0x5d3   :  { %969 = vmatpush.msra.mxu1 %v940_v27  ;;  %997 = vmatpush.msrb.mxu2 %v992_v42 }
 0x5d5   :  { %998 = vmatpush.msrb.mxu2 %v991_v46 }
 0x5d6   :  { %v818_v54 = vpop.permute.xlu1 %817 }
 0x5d7   :  { %838 = vmatpush.msra.mxu0 %v818_v54  ;;  %999 = vmatpush.msrb.mxu2 %v990_v48  ;;  %v987_v54 = vld [vmem:[%s1538_s9 + $0x40] sm:$0xff] }
 0x5d8   :  { %1077 = vmatmul.msk.f32.vlgmr.msra.gmra.mxu0 %vm113_vm1, %v790_v55  ;;  %v678_v4 = vpop.f32.mrf.mxu2 }
 0x5d9   :  { %v682_v8 = vadd.f32 %v678_v4, %v489_v5  ;;  %1000 = vmatpush.msrb.mxu2 %v989_v49  ;;  %v982_v4 = vld [vmem:[%s1538_s9 + $0x18] sm:$0xff] }
 0x5db   :  { %1001 = vmatpush.msrb.mxu2 %v988_v51 }
 0x5dd   :  { %1002 = vmatpush.msrb.mxu2 %v987_v54 }
 0x5df   :  { %1003 = vmatpush.msrb.mxu2 %v986_v57 }
 0x636   :  { %v814_v58 = vpop.f32.mrf.mxu1 }
 0x637   :  { %1078 = vmatmul.msk.f32.vlgmr.msra.gmra.mxu3 %vm113_vm1, %v814_v58 }
 0x655   :  { %v840_v61 = vpop.f32.mrf.mxu0 }
 0x656   :  { %1079 = vmatmul.msk.f32.gmra.mxu3 %vm113_vm1, %v840_v61  ;;  %v985_v61 = vld [vmem:[%s1538_s9 + $0x30] sm:$0xff] }
 0x657   :  { %1004 = vmatpush.msrb.mxu2 %v985_v61 }
 0x6ba   :  { %v867_v0 = vpop.f32.mrf.mxu3 }
 0x6bb   :  { %v873_v1 = vadd.f32 %v867_v0, %v681_v63  ;;  %v984_v63 = vld [vmem:[%s1538_s9 + $0x28] sm:$0xff] }
 0x6bc   :  { %1005 = vmatpush.msrb.mxu2 %v984_v63 }
 0x6bd   :  { %v1428_v2 = vmul.f32 %v873_v1, %v1318_v52  ;;  %v1180_v52 = vmov 32.0   ;;  %v983_v1 = vld [vmem:[%s1538_s9 + $0x20] sm:$0xff] }
 0x6be   :  { %1136 = vrcp.f32 %v1180_v52  ;;  %1006 = vmatpush.msrb.mxu2 %v983_v1  ;;  %v981_v52 = vld [vmem:[%s1538_s9 + $0x10] sm:$0xff] }
 0x6bf   :  { %v877_v3 = vsel %vm51_vm0, %v1428_v2, 0.0 }
 0x6c0   :  { %878 = vadd.xlane.f32.xlu0 %v877_v3  ;;  %1007 = vmatpush.msrb.mxu2 %v982_v4 }
 0x6c2   :  { %1008 = vmatpush.msrb.mxu2 %v981_v52 }
 0x6c4   :  { %v1137_v11 = vpop.eup %1136 }
 0x6c5   :  { %v884_v12 = vmul.f32 32.0, %v1137_v11  ;;  %vm888_vm1 = vweird.f32 %v1137_v11 }
 0x6c7   :  { %v885_v13 = vsub.f32 1.0, %v884_v12  ;;  %v979_v12 = vld [vmem:[%s1538_s9] sm:$0xff] }
 0x6c9   :  { %v886_v14 = vmul.f32 %v1137_v11, %v885_v13  ;;  %v1102_v13 = vld [vmem:[%s1537_s8] ss:$0 sm:$0xff] }
 0x6cb   :  { %v887_v15 = vadd.f32 %v1137_v11, %v886_v14 }
 0x6cd   :  { %v889_v16 = vsel %vm888_vm1, %v1137_v11, %v887_v15  ;;  %v980_v11 = vld [vmem:[%s1538_s9 + $0x8] sm:$0xff]  ;;  %s1181_s9 = smov [#allocation2]  }
 0x6ce   :  { %1009 = vmatpush.msrb.mxu2 %v980_v11  ;;  %s1032_s8 = sshll.u32 %s1181_s9, 4  ;;  %s1033_s8 = int_to_ptr.vmem [resolvable:$true] %s1032_s8 }
 0x6d0   :  { %1010 = vmatpush.msrb.mxu2 %v979_v12 }
 0x6d9   :  { %v870_v9 = vpop.f32.mrf.mxu3 }
 0x6da   :  { %v874_v23 = vadd.f32 %v870_v9, %v682_v8 }
 0x6dc   :  { %v1435_v10 = vmul.f32 %v874_v23, %v1336_v59 }
 0x6de   :  { %v880_v50 = vsel %vm51_vm0, %v1435_v10, 0.0 }
 0x6df   :  { %881 = vadd.xlane.f32.xlu2 %v880_v50 }
 0x733   :  { %v879_v44 = vpop.xlane.xlu0 %878 }
 0x734   :  { %v890_v56 = vmul.f32 %v889_v16, %v879_v44 }
 0x736   :  { %v892_v17 = vsub.f32 %v1428_v2, %v890_v56 }
 0x738   :  { %v894_v34 = vmul.f32 %v892_v17, %v892_v17 }
 0x73a   :  { %v896_v59 = vsel %vm51_vm0, %v894_v34, 0.0  ;;  %v1103_v34 = vld [vmem:[%s1539_s10] ss:$0 sm:$0xff]  ;;  %s1182_s10 = smov 128  }
 0x73b   :  { %897 = vadd.xlane.f32.xlu1 %v896_v59 }
 0x752   :  { %v882_v18 = vpop.xlane.xlu2 %881 }
 0x753   :  { %v891_v19 = vmul.f32 %v889_v16, %v882_v18 }
 0x755   :  { %v1442_v20 = vsub.f32 %v1435_v10, %v891_v19 }
 0x757   :  { %v895_v21 = vmul.f32 %v1442_v20, %v1442_v20 }
 0x759   :  { %v899_v22 = vsel %vm51_vm0, %v895_v21, 0.0 }
 0x75a   :  { %900 = vadd.xlane.f32.xlu0 %v899_v22 }
 0x7ae   :  { %v898_v28 = vpop.xlane.xlu1 %897 }
 0x7af   :  { %v902_v7 = vmul.f32 %v898_v28, %v889_v16 }
 0x7b1   :  { %v904_v29 = vadd.f32 1e-05, %v902_v7 }
 0x7b3   :  { %1138 = vrsqrt.f32 %v904_v29  ;;  %vm912_vm2 = vweird.f32 %v904_v29 }
 0x7b9   :  { %v1139_v30 = vpop.eup %1138 }
 0x7ba   :  { %v907_v31 = vmul.f32 %v1139_v30, %v904_v29  ;;  %vm913_vm15 = vweird.f32 %v1139_v30 }
 0x7bb   :  { %vm914_vm5 = vmor %vm912_vm2, %vm913_vm15 }
 0x7bc   :  { %v908_v32 = vmul.f32 %v1139_v30, %v907_v31 }
 0x7be   :  { %v909_v33 = vmul.f32 0.5, %v908_v32 }
 0x7c0   :  { %v910_v35 = vsub.f32 1.5, %v909_v33 }
 0x7c2   :  { %v911_v36 = vmul.f32 %v1139_v30, %v910_v35 }
 0x7c4   :  { %v915_v37 = vsel %vm914_vm5, %v1139_v30, %v911_v36 }
 0x7c5   :  { %v926_v6 = vmul.f32 %v915_v37, %v892_v17 }
 0x7c7   :  { %v932_v39 = vmul.f32 %v1100_v53, %v926_v6 }
 0x7c9   :  { %v938_v60 = vadd.f32 %v1101_v38, %v932_v39 }
 0x7cb   :  { %1080 = vmatmul.msk.f32.vlgmr.msra.gmra.mxu1 %vm51_vm0, %v938_v60 }
 0x7cd   :  { %v901_v43 = vpop.xlane.xlu0 %900 }
 0x7ce   :  { %v903_v45 = vmul.f32 %v901_v43, %v889_v16 }
 0x7d0   :  { %v905_v47 = vadd.f32 1e-05, %v903_v45 }
 0x7d2   :  { %1140 = vrsqrt.f32 %v905_v47  ;;  %vm922_vm4 = vweird.f32 %v905_v47 }
 0x7d8   :  { %v1141_v55 = vpop.eup %1140 }
 0x7d9   :  { %v917_v58 = vmul.f32 %v1141_v55, %v905_v47  ;;  %vm923_vm3 = vweird.f32 %v1141_v55 }
 0x7da   :  { %vm924_vm6 = vmor %vm922_vm4, %vm923_vm3 }
 0x7db   :  { %v918_v62 = vmul.f32 %v1141_v55, %v917_v58 }
 0x7dd   :  { %v919_v0 = vmul.f32 0.5, %v918_v62 }
 0x7df   :  { %v920_v3 = vsub.f32 1.5, %v919_v0 }
 0x7e1   :  { %v921_v5 = vmul.f32 %v1141_v55, %v920_v3 }
 0x7e3   :  { %v925_v8 = vsel %vm924_vm6, %v1141_v55, %v921_v5 }
 0x7e4   :  { %v927_v9 = vmul.f32 %v925_v8, %v1442_v20 }
 0x7e6   :  { %v933_v23 = vmul.f32 %v1100_v53, %v927_v9 }
 0x7e8   :  { %v939_v50 = vadd.f32 %v1101_v38, %v933_v23 }
 0x7ea   :  { %1081 = vmatmul.msk.f32.gmra.mxu1 %vm51_vm0, %v939_v50 }
 0x848   :  { %v971_v14 = vpop.f32.mrf.mxu1 }
 0x849   :  { %v972_v15 = vadd.f32 %v1102_v13, %v971_v14 }
 0x84b   :  { %v977_v16 = vmax.f32 %v972_v15, 0.0 }
 0x84d   :  { %1011 = vmatmul.f32.vlgmr.msrb.gmra.mxu2 %v977_v16 }
 0x867   :  { %v974_v44 = vpop.f32.mrf.mxu1 }
 0x868   :  { %v975_v56 = vadd.f32 %v1102_v13, %v974_v44 }
 0x86a   :  { %v978_v17 = vmax.f32 %v975_v56, 0.0 }
 0x86c   :  { %1014 = vmatmul.f32.gmra.mxu2 %v978_v17 }
 0x8d0   :  { %v1012_v59 = vpop.f32.mrf.mxu2 }
 0x8d1   :  { %v1018_v18 = vadd.f32 %v1012_v59, %v1428_v2 }
 0x8d3   :  { %v1024_v19 = vadd.f32 %v1103_v34, %v1018_v18 }
 0x8d5   :  { %1026 = vst.msk [vmem:[#allocation2] sm:$0xff] %vm51_vm0, %v1024_v19 }
 0x8ef   :  { %v1015_v20 = vpop.f32.mrf.mxu2 }
 0x8f0   :  { %v1019_v21 = vadd.f32 %v1015_v20, %v1435_v10 }
 0x8f2   :  { %v1025_v22 = vadd.f32 %v1103_v34, %v1019_v21 }
 0x8f4   :  { %1027 = vst.msk [vmem:[#allocation2 + $0x8] sm:$0xff] %vm51_vm0, %v1025_v22 }
 0x8f5   :  { %1040 = dma.vmem_to_hbm [thread:$0]  %s1033_s8, 256, %s1035_s29, [#allocation3], %s1182_s10, %s1182_s10, %s1183_s3  }
 0x8f6   :  { %1166 = dma.done.wait [#allocation3], 256  }
 0x8f7   :  { %1167 = vsyncadd [#allocation3], 4294967040 }
 0x8f8   :  { %1045 = vsyncpa [#allocation3], 1 }

</bundles_post_ra>
